<compile_context>
chip_gen: v7x
topology: tpu7x:2x2x1
jax: 0.10.0
libtpu: 0.0.40
codegen_flags: <defaults>
</compile_context>

<pallas_src>
import jax
import jax.numpy as jnp
from jax.experimental import pallas as pl
from jax.experimental.pallas import tpu as pltpu


def _vmem():
    return pl.BlockSpec(memory_space=pltpu.MemorySpace.VMEM)


def _round_up(n, m):
    return ((n + m - 1) // m) * m


def make_decoder_kernel(n_layers):
    """Fused single-step Bahdanau-attention GRU decoder kernel."""

    def kernel(*refs):
        (ht_ref, emb_ref, hid_ref, wah_ref, was_ref, ba_ref, v_ref) = refs[:7]
        gru_refs = refs[7:7 + 4 * n_layers]
        wout_ref = refs[7 + 4 * n_layers]
        bout_ref = refs[8 + 4 * n_layers]
        logp_ref, hidout_ref, attw_ref = refs[9 + 4 * n_layers:]

        S, B, H = ht_ref.shape
        s_pad = attw_ref.shape[-1]

        ht = ht_ref[...]                                         # (S, B, H) bf16

        # ---------------- Bahdanau attention (time-major) ----------------
        # energy = tanh(HT @ Wah + st @ Was + b)   (concat [HT, ST] split into 2 mms)
        e_h = jnp.einsum('sbh,hk->sbk', ht, wah_ref[...],
                         preferred_element_type=jnp.float32)     # (S,B,H) f32
        st = hid_ref[n_layers - 1]                               # (B,H) f32
        e_s = jnp.dot(st.astype(jnp.bfloat16), was_ref[...],
                      preferred_element_type=jnp.float32)        # (B,H) f32
        energy = jnp.tanh(e_h + e_s[None, :, :] + ba_ref[...][None, :, :])

        # score = energy . v  as an MXU contraction over H  -> (S, B, 1)
        score = jnp.einsum('sbh,hk->sbk', energy.astype(jnp.bfloat16), v_ref[...],
                           preferred_element_type=jnp.float32)

        # numerically stable softmax over S (leading axis); approx reciprocal -> EUP
        m = jnp.max(score, axis=0, keepdims=True)
        p = jnp.exp(score - m)
        attw = p * pl.reciprocal(jnp.sum(p, axis=0, keepdims=True), approx=True)

        # context[b] = sum_s attw[s,b] * HT[s,b,:]  (leading-axis sum: vreg adds)
        ctx = jnp.sum(attw * ht.astype(jnp.float32), axis=0)     # (B,H) f32

        # lane-dense attention-weight output: (B, s_pad)
        attw_bs = attw[:, :, 0].T                                # (B,S)
        if s_pad > S:
            attw_bs = jnp.concatenate(
                [attw_bs, jnp.zeros((B, s_pad - S), jnp.float32)], axis=-1)
        attw_ref[...] = attw_bs

        # ---------------- GRU stack (gates r,z,n concatenated: 2 matmuls/layer) ----
        x_in = jnp.concatenate([emb_ref[...], ctx.astype(jnp.bfloat16)], axis=-1)
        for l in range(n_layers):
            wih, whh, bih, bhh = gru_refs[4 * l: 4 * l + 4]
            h_prev = hid_ref[l]                                               # (B,H) f32
            gi = jnp.dot(x_in, wih[...],
                         preferred_element_type=jnp.float32) + bih[...]       # (B,3H)
            gh = jnp.dot(h_prev.astype(jnp.bfloat16), whh[...],
                         preferred_element_type=jnp.float32) + bhh[...]       # (B,3H)
            r = jax.nn.sigmoid(gi[:, :H] + gh[:, :H])
            z = jax.nn.sigmoid(gi[:, H:2 * H] + gh[:, H:2 * H])
            n = jnp.tanh(gi[:, 2 * H:] + r * gh[:, 2 * H:])
            h_new = (1.0 - z) * n + z * h_prev                                # (B,H) f32
            hidout_ref[l] = h_new
            x_in = h_new.astype(jnp.bfloat16)

        # ------------- output projection + log_softmax (V padded to 128·k) -------
        # Padded columns have zero weights and -1e30 bias, so they contribute
        # exp(-inf)=0 to the normalizer and are sliced off in the wrapper.
        logits = jnp.dot(x_in, wout_ref[...],
                         preferred_element_type=jnp.float32) + bout_ref[...]  # (B,Vpad)
        m2 = jnp.max(logits, axis=-1, keepdims=True)
        lse = m2 + jnp.log(jnp.sum(jnp.exp(logits - m2), axis=-1, keepdims=True))
        logp_ref[...] = logits - lse

    return kernel


def decoder_forward(x, latest_hid, HT, params):
    """x: (1,B) int32 tokens; latest_hid: (L,B,H) f32; HT: (S,B,H) f32 (time-major)."""
    n_layers = len(params['gru'])
    S, B, H = HT.shape
    V = params['emb'].shape[0]
    v_pad = params['wout'].shape[1]
    s_pad = _round_up(S, 128)

    # Embedding gather is wrapper-side glue (plain XLA gather).
    emb = params['emb'][x[0]].astype(jnp.bfloat16)               # (B, E) bf16
    ht = HT.astype(jnp.bfloat16)                                 # keep time-major

    inputs = [ht, emb, latest_hid,
              params['wah'], params['was'], params['ba'], params['v']]
    for wih, whh, bih, bhh in params['gru']:
        inputs += [wih, whh, bih, bhh]
    inputs += [params['wout'], params['bout']]

    logp_pad, hidden, attw_pad = pl.pallas_call(
        make_decoder_kernel(n_layers),
        out_shape=(jax.ShapeDtypeStruct((B, v_pad), jnp.float32),
                   jax.ShapeDtypeStruct((n_layers, B, H), jnp.float32),
                   jax.ShapeDtypeStruct((B, s_pad), jnp.float32)),
        in_specs=[_vmem()] * len(inputs),
        out_specs=(_vmem(), _vmem(), _vmem()),
    )(*inputs)

    log_prob = logp_pad[:, :V][None]                             # (1, B, V)
    attn_weight = attw_pad[:, :S][:, None, :]                    # (B, 1, S)
    return log_prob, hidden, attn_weight


if __name__ == "__main__":
    B, S, H, E, V, L = 2, 8, 32, 16, 64, 2

    key = jax.random.PRNGKey(0)
    ks = jax.random.split(key, 6 + L)

    # Parameters (deterministic synthetic init mirroring the module's shapes)
    emb_tbl = jax.random.uniform(ks[0], (V, E), jnp.float32, -0.1, 0.1)   # Embedding(voc, emb)
    w_attn = jax.random.normal(ks[1], (H, 2 * H), jnp.float32) * 0.1      # Linear(2H, H).weight
    b_attn = jax.random.normal(ks[2], (H,), jnp.float32) * 0.1            # Linear(2H, H).bias
    v_attn = 0.02 + jax.random.normal(ks[3], (H,), jnp.float32)           # nn.init.normal_(v, 0.02)
    w_out = jax.random.normal(ks[4], (V, H), jnp.float32) * 0.1           # Linear(H, V).weight
    b_out = jax.random.normal(ks[5], (V,), jnp.float32) * 0.1             # Linear(H, V).bias

    # Lane-dense padded output projection
    v_pad = _round_up(V, 128)
    wout_pad = jnp.zeros((H, v_pad), jnp.float32).at[:, :V].set(w_out.T)
    bout_pad = jnp.full((1, v_pad), -1e30, jnp.float32).at[:, :V].set(b_out)

    gru_params = []
    for l in range(L):
        din = (E + H) if l == 0 else H
        kk = jax.random.split(ks[6 + l], 4)
        # gates ordered (r, z, n), stored pre-transposed and concatenated: (din, 3H)
        wih = jax.random.normal(kk[0], (din, 3 * H), jnp.float32) * 0.1
        whh = jax.random.normal(kk[1], (H, 3 * H), jnp.float32) * 0.1
        bih = jax.random.normal(kk[2], (1, 3 * H), jnp.float32) * 0.1
        bhh = jax.random.normal(kk[3], (1, 3 * H), jnp.float32) * 0.1
        gru_params.append((wih.astype(jnp.bfloat16), whh.astype(jnp.bfloat16), bih, bhh))

    params = dict(
        emb=emb_tbl,
        wah=w_attn[:, :H].T.astype(jnp.bfloat16),   # (H,H) — applies to HT half of concat
        was=w_attn[:, H:].T.astype(jnp.bfloat16),   # (H,H) — applies to ST half
        ba=b_attn[None, :],                         # (1,H) f32
        v=v_attn[:, None].astype(jnp.bfloat16),     # (H,1) — MXU score contraction
        gru=gru_params,
        wout=wout_pad.astype(jnp.bfloat16),         # (H, Vpad) bf16, lane-dense
        bout=bout_pad,                              # (1, Vpad) f32, -1e30 in pad cols
    )

    # Inputs
    ik = jax.random.split(jax.random.PRNGKey(1), 3)
    x = jax.random.randint(ik[0], (1, B), 0, V, dtype=jnp.int32)          # single decode step
    latest_hid = jax.random.normal(ik[1], (L, B, H), jnp.float32)
    HT = jax.random.normal(ik[2], (S, B, H), jnp.float32)                 # encoder outputs, time-major

    fwd = jax.jit(decoder_forward)
    log_prob, hidden, attn_weight = fwd(x, latest_hid, HT, params)
    jax.block_until_ready((log_prob, hidden, attn_weight))

    # light sanity checks
    assert log_prob.shape == (1, B, V)
    assert hidden.shape == (L, B, H)
    assert attn_weight.shape == (B, 1, S)
    assert bool(jnp.all(jnp.isfinite(log_prob)))
    assert bool(jnp.all(jnp.isfinite(hidden)))
    # approx reciprocal in the softmax => slightly looser tolerance on the sum
    assert jnp.allclose(jnp.sum(attn_weight, axis=-1), 1.0, atol=5e-3)
    assert jnp.allclose(jnp.sum(jnp.exp(log_prob), axis=-1), 1.0, atol=1e-4)

    print("KERNEL_OK")
</pallas_src>

<mosaic_0001>
module attributes {stable_mosaic.version = 11 : i64} {
  func.func @kernel(%arg0: memref<8x2x32xbf16, #tpu.memory_space<vmem>>, %arg1: memref<2x16xbf16, #tpu.memory_space<vmem>>, %arg2: memref<2x2x32xf32, #tpu.memory_space<vmem>>, %arg3: memref<32x32xbf16, #tpu.memory_space<vmem>>, %arg4: memref<32x32xbf16, #tpu.memory_space<vmem>>, %arg5: memref<1x32xf32, #tpu.memory_space<vmem>>, %arg6: memref<32x1xbf16, #tpu.memory_space<vmem>>, %arg7: memref<48x96xbf16, #tpu.memory_space<vmem>>, %arg8: memref<32x96xbf16, #tpu.memory_space<vmem>>, %arg9: memref<1x96xf32, #tpu.memory_space<vmem>>, %arg10: memref<1x96xf32, #tpu.memory_space<vmem>>, %arg11: memref<32x96xbf16, #tpu.memory_space<vmem>>, %arg12: memref<32x96xbf16, #tpu.memory_space<vmem>>, %arg13: memref<1x96xf32, #tpu.memory_space<vmem>>, %arg14: memref<1x96xf32, #tpu.memory_space<vmem>>, %arg15: memref<32x128xbf16, #tpu.memory_space<vmem>>, %arg16: memref<1x128xf32, #tpu.memory_space<vmem>>, %arg17: memref<2x128xf32, #tpu.memory_space<vmem>>, %arg18: memref<2x2x32xf32, #tpu.memory_space<vmem>>, %arg19: memref<2x128xf32, #tpu.memory_space<vmem>>) attributes {dimension_semantics = [], scalar_prefetch = 0 : i64, scratch_operands = 0 : i64, tpu.core_type = #tpu.core_type<tc>} {
    %c0 = arith.constant 0 : index
    %c0_0 = arith.constant 0 : index
    %c0_1 = arith.constant 0 : index
    %0 = vector.load %arg0[%c0, %c0_0, %c0_1] : memref<8x2x32xbf16, #tpu.memory_space<vmem>>, vector<8x2x32xbf16>
    %c0_2 = arith.constant 0 : index
    %c0_3 = arith.constant 0 : index
    %1 = vector.load %arg3[%c0_2, %c0_3] : memref<32x32xbf16, #tpu.memory_space<vmem>>, vector<32x32xbf16>
    "tpu.trace_start"() <{level = 10 : i32, message = "sbh,hk->sbk"}> : () -> ()
    %cst = arith.constant dense<0.000000e+00> : vector<8x2x32xf32>
    %2 = tpu.matmul %0, %1, %cst {dimension_numbers = #tpu.dot_dimension_numbers<[2], [0], [0, 1], [1], [0, 0, 0, 1, 1, 1], [], []>} : vector<8x2x32xbf16>, vector<32x32xbf16>, vector<8x2x32xf32> -> vector<8x2x32xf32>
    "tpu.trace_stop"() : () -> ()
    %c1 = arith.constant 1 : index
    %c0_4 = arith.constant 0 : index
    %c0_5 = arith.constant 0 : index
    %3 = vector.load %arg2[%c1, %c0_4, %c0_5] : memref<2x2x32xf32, #tpu.memory_space<vmem>>, vector<1x2x32xf32>
    %4 = vector.shape_cast %3 : vector<1x2x32xf32> to vector<2x32xf32>
    %5 = arith.truncf %4 : vector<2x32xf32> to vector<2x32xbf16>
    %c0_6 = arith.constant 0 : index
    %c0_7 = arith.constant 0 : index
    %6 = vector.load %arg4[%c0_6, %c0_7] : memref<32x32xbf16, #tpu.memory_space<vmem>>, vector<32x32xbf16>
    %cst_8 = arith.constant dense<0.000000e+00> : vector<2x32xf32>
    %7 = tpu.matmul %5, %6, %cst_8 {dimension_numbers = #tpu.dot_dimension_numbers<[1], [0], [0], [1], [0, 0, 1, 1], [], []>} : vector<2x32xbf16>, vector<32x32xbf16>, vector<2x32xf32> -> vector<2x32xf32>
    %8 = vector.shape_cast %7 : vector<2x32xf32> to vector<1x2x32xf32>
    %9 = vector.broadcast %8 : vector<1x2x32xf32> to vector<8x2x32xf32>
    %10 = arith.addf %2, %9 : vector<8x2x32xf32>
    %c0_9 = arith.constant 0 : index
    %c0_10 = arith.constant 0 : index
    %11 = vector.load %arg5[%c0_9, %c0_10] : memref<1x32xf32, #tpu.memory_space<vmem>>, vector<1x32xf32>
    %12 = vector.shape_cast %11 : vector<1x32xf32> to vector<1x1x32xf32>
    %13 = vector.broadcast %12 : vector<1x1x32xf32> to vector<8x2x32xf32>
    %14 = arith.addf %10, %13 : vector<8x2x32xf32>
    %15 = math.tanh %14 : vector<8x2x32xf32>
    %16 = arith.truncf %15 : vector<8x2x32xf32> to vector<8x2x32xbf16>
    %c0_11 = arith.constant 0 : index
    %c0_12 = arith.constant 0 : index
    %17 = vector.load %arg6[%c0_11, %c0_12] : memref<32x1xbf16, #tpu.memory_space<vmem>>, vector<32x1xbf16>
    "tpu.trace_start"() <{level = 10 : i32, message = "sbh,hk->sbk"}> : () -> ()
    %cst_13 = arith.constant dense<0.000000e+00> : vector<8x2x1xf32>
    %18 = tpu.matmul %16, %17, %cst_13 {dimension_numbers = #tpu.dot_dimension_numbers<[2], [0], [0, 1], [1], [0, 0, 0, 1, 1, 1], [], []>} : vector<8x2x32xbf16>, vector<32x1xbf16>, vector<8x2x1xf32> -> vector<8x2x1xf32>
    "tpu.trace_stop"() : () -> ()
    %cst_14 = arith.constant dense<0xFF800000> : vector<2x1xf32>
    %19 = vector.multi_reduction <maximumf>, %18, %cst_14 [0] : vector<8x2x1xf32> to vector<2x1xf32>
    %20 = vector.shape_cast %19 : vector<2x1xf32> to vector<1x2x1xf32>
    %21 = vector.broadcast %20 : vector<1x2x1xf32> to vector<8x2x1xf32>
    %22 = arith.subf %18, %21 : vector<8x2x1xf32>
    %23 = math.exp %22 : vector<8x2x1xf32>
    %cst_15 = arith.constant dense<0.000000e+00> : vector<2x1xf32>
    %24 = vector.multi_reduction <add>, %23, %cst_15 [0] : vector<8x2x1xf32> to vector<2x1xf32>
    %25 = vector.shape_cast %24 : vector<2x1xf32> to vector<1x2x1xf32>
    %26 = tpu.reciprocal %25 {approx = true} : vector<1x2x1xf32> -> vector<1x2x1xf32>
    %27 = vector.broadcast %26 : vector<1x2x1xf32> to vector<8x2x1xf32>
    %28 = arith.mulf %23, %27 : vector<8x2x1xf32>
    %29 = arith.extf %0 : vector<8x2x32xbf16> to vector<8x2x32xf32>
    %30 = vector.broadcast %28 : vector<8x2x1xf32> to vector<8x2x32xf32>
    %31 = arith.mulf %30, %29 : vector<8x2x32xf32>
    %cst_16 = arith.constant dense<0.000000e+00> : vector<2x32xf32>
    %32 = vector.multi_reduction <add>, %31, %cst_16 [0] : vector<8x2x32xf32> to vector<2x32xf32>
    %33 = vector.shape_cast %28 : vector<8x2x1xf32> to vector<8x2xf32>
    %34 = tpu.transpose %33, [1, 0] : vector<8x2xf32> -> vector<2x8xf32>
    %cst_17 = arith.constant 0.000000e+00 : f32
    %35 = vector.broadcast %cst_17 : f32 to vector<2x120xf32>
    %36 = tpu.concatenate %34, %35 in 1 : vector<2x8xf32>, vector<2x120xf32> -> vector<2x128xf32>
    %c0_18 = arith.constant 0 : index
    %c0_19 = arith.constant 0 : index
    %37 = vector.load %arg19[%c0_18, %c0_19] : memref<2x128xf32, #tpu.memory_space<vmem>>, vector<2x128xf32>
    tpu.vector_store %arg19[%c0_18, %c0_19], %36 {strides = array<i32>} : memref<2x128xf32, #tpu.memory_space<vmem>>, vector<2x128xf32>,
    %c0_20 = arith.constant 0 : index
    %c0_21 = arith.constant 0 : index
    %38 = vector.load %arg1[%c0_20, %c0_21] : memref<2x16xbf16, #tpu.memory_space<vmem>>, vector<2x16xbf16>
    %39 = arith.truncf %32 : vector<2x32xf32> to vector<2x32xbf16>
    %40 = tpu.concatenate %38, %39 in 1 : vector<2x16xbf16>, vector<2x32xbf16> -> vector<2x48xbf16>
    %c0_22 = arith.constant 0 : index
    %c0_23 = arith.constant 0 : index
    %c0_24 = arith.constant 0 : index
    %41 = vector.load %arg2[%c0_22, %c0_23, %c0_24] : memref<2x2x32xf32, #tpu.memory_space<vmem>>, vector<1x2x32xf32>
    %42 = vector.shape_cast %41 : vector<1x2x32xf32> to vector<2x32xf32>
    %c0_25 = arith.constant 0 : index
    %c0_26 = arith.constant 0 : index
    %43 = vector.load %arg7[%c0_25, %c0_26] : memref<48x96xbf16, #tpu.memory_space<vmem>>, vector<48x96xbf16>
    %cst_27 = arith.constant dense<0.000000e+00> : vector<2x96xf32>
    %44 = tpu.matmul %40, %43, %cst_27 {dimension_numbers = #tpu.dot_dimension_numbers<[1], [0], [0], [1], [0, 0, 1, 1], [], []>} : vector<2x48xbf16>, vector<48x96xbf16>, vector<2x96xf32> -> vector<2x96xf32>
    %c0_28 = arith.constant 0 : index
    %c0_29 = arith.constant 0 : index
    %45 = vector.load %arg9[%c0_28, %c0_29] : memref<1x96xf32, #tpu.memory_space<vmem>>, vector<1x96xf32>
    %46 = vector.broadcast %45 : vector<1x96xf32> to vector<2x96xf32>
    %47 = arith.addf %44, %46 : vector<2x96xf32>
    %48 = arith.truncf %42 : vector<2x32xf32> to vector<2x32xbf16>
    %c0_30 = arith.constant 0 : index
    %c0_31 = arith.constant 0 : index
    %49 = vector.load %arg8[%c0_30, %c0_31] : memref<32x96xbf16, #tpu.memory_space<vmem>>, vector<32x96xbf16>
    %cst_32 = arith.constant dense<0.000000e+00> : vector<2x96xf32>
    %50 = tpu.matmul %48, %49, %cst_32 {dimension_numbers = #tpu.dot_dimension_numbers<[1], [0], [0], [1], [0, 0, 1, 1], [], []>} : vector<2x32xbf16>, vector<32x96xbf16>, vector<2x96xf32> -> vector<2x96xf32>
    %c0_33 = arith.constant 0 : index
    %c0_34 = arith.constant 0 : index
    %51 = vector.load %arg10[%c0_33, %c0_34] : memref<1x96xf32, #tpu.memory_space<vmem>>, vector<1x96xf32>
    %52 = vector.broadcast %51 : vector<1x96xf32> to vector<2x96xf32>
    %53 = arith.addf %50, %52 : vector<2x96xf32>
    %54 = vector.extract_strided_slice %47 {offsets = [0, 0], sizes = [2, 32], strides = [1, 1]} : vector<2x96xf32> to vector<2x32xf32>
    %55 = vector.extract_strided_slice %53 {offsets = [0, 0], sizes = [2, 32], strides = [1, 1]} : vector<2x96xf32> to vector<2x32xf32>
    %56 = arith.addf %54, %55 : vector<2x32xf32>
    %57 = arith.negf %56 : vector<2x32xf32>
    %58 = math.exp %57 : vector<2x32xf32>
    %cst_35 = arith.constant 1.000000e+00 : f32
    %59 = vector.broadcast %cst_35 : f32 to vector<2x32xf32>
    %60 = arith.addf %59, %58 : vector<2x32xf32>
    %61 = arith.divf %59, %60 : vector<2x32xf32>
    %62 = vector.extract_strided_slice %47 {offsets = [0, 32], sizes = [2, 32], strides = [1, 1]} : vector<2x96xf32> to vector<2x32xf32>
    %63 = vector.extract_strided_slice %53 {offsets = [0, 32], sizes = [2, 32], strides = [1, 1]} : vector<2x96xf32> to vector<2x32xf32>
    %64 = arith.addf %62, %63 : vector<2x32xf32>
    %65 = arith.negf %64 : vector<2x32xf32>
    %66 = math.exp %65 : vector<2x32xf32>
    %cst_36 = arith.constant 1.000000e+00 : f32
    %67 = vector.broadcast %cst_36 : f32 to vector<2x32xf32>
    %68 = arith.addf %67, %66 : vector<2x32xf32>
    %69 = arith.divf %67, %68 : vector<2x32xf32>
    %70 = vector.extract_strided_slice %47 {offsets = [0, 64], sizes = [2, 32], strides = [1, 1]} : vector<2x96xf32> to vector<2x32xf32>
    %71 = vector.extract_strided_slice %53 {offsets = [0, 64], sizes = [2, 32], strides = [1, 1]} : vector<2x96xf32> to vector<2x32xf32>
    %72 = arith.mulf %61, %71 : vector<2x32xf32>
    %73 = arith.addf %70, %72 : vector<2x32xf32>
    %74 = math.tanh %73 : vector<2x32xf32>
    %cst_37 = arith.constant 1.000000e+00 : f32
    %75 = vector.broadcast %cst_37 : f32 to vector<2x32xf32>
    %76 = arith.subf %75, %69 : vector<2x32xf32>
    %77 = arith.mulf %76, %74 : vector<2x32xf32>
    %78 = arith.mulf %69, %42 : vector<2x32xf32>
    %79 = arith.addf %77, %78 : vector<2x32xf32>
    %c0_38 = arith.constant 0 : index
    %c0_39 = arith.constant 0 : index
    %c0_40 = arith.constant 0 : index
    %80 = vector.load %arg18[%c0_38, %c0_39, %c0_40] : memref<2x2x32xf32, #tpu.memory_space<vmem>>, vector<1x2x32xf32>
    %81 = vector.shape_cast %80 : vector<1x2x32xf32> to vector<2x32xf32>
    %82 = vector.shape_cast %79 : vector<2x32xf32> to vector<1x2x32xf32>
    tpu.vector_store %arg18[%c0_38, %c0_39, %c0_40], %82 {strides = array<i32>} : memref<2x2x32xf32, #tpu.memory_space<vmem>>, vector<1x2x32xf32>,
    %83 = arith.truncf %79 : vector<2x32xf32> to vector<2x32xbf16>
    %c1_41 = arith.constant 1 : index
    %c0_42 = arith.constant 0 : index
    %c0_43 = arith.constant 0 : index
    %84 = vector.load %arg2[%c1_41, %c0_42, %c0_43] : memref<2x2x32xf32, #tpu.memory_space<vmem>>, vector<1x2x32xf32>
    %85 = vector.shape_cast %84 : vector<1x2x32xf32> to vector<2x32xf32>
    %c0_44 = arith.constant 0 : index
    %c0_45 = arith.constant 0 : index
    %86 = vector.load %arg11[%c0_44, %c0_45] : memref<32x96xbf16, #tpu.memory_space<vmem>>, vector<32x96xbf16>
    %cst_46 = arith.constant dense<0.000000e+00> : vector<2x96xf32>
    %87 = tpu.matmul %83, %86, %cst_46 {dimension_numbers = #tpu.dot_dimension_numbers<[1], [0], [0], [1], [0, 0, 1, 1], [], []>} : vector<2x32xbf16>, vector<32x96xbf16>, vector<2x96xf32> -> vector<2x96xf32>
    %c0_47 = arith.constant 0 : index
    %c0_48 = arith.constant 0 : index
    %88 = vector.load %arg13[%c0_47, %c0_48] : memref<1x96xf32, #tpu.memory_space<vmem>>, vector<1x96xf32>
    %89 = vector.broadcast %88 : vector<1x96xf32> to vector<2x96xf32>
    %90 = arith.addf %87, %89 : vector<2x96xf32>
    %91 = arith.truncf %85 : vector<2x32xf32> to vector<2x32xbf16>
    %c0_49 = arith.constant 0 : index
    %c0_50 = arith.constant 0 : index
    %92 = vector.load %arg12[%c0_49, %c0_50] : memref<32x96xbf16, #tpu.memory_space<vmem>>, vector<32x96xbf16>
    %cst_51 = arith.constant dense<0.000000e+00> : vector<2x96xf32>
    %93 = tpu.matmul %91, %92, %cst_51 {dimension_numbers = #tpu.dot_dimension_numbers<[1], [0], [0], [1], [0, 0, 1, 1], [], []>} : vector<2x32xbf16>, vector<32x96xbf16>, vector<2x96xf32> -> vector<2x96xf32>
    %c0_52 = arith.constant 0 : index
    %c0_53 = arith.constant 0 : index
    %94 = vector.load %arg14[%c0_52, %c0_53] : memref<1x96xf32, #tpu.memory_space<vmem>>, vector<1x96xf32>
    %95 = vector.broadcast %94 : vector<1x96xf32> to vector<2x96xf32>
    %96 = arith.addf %93, %95 : vector<2x96xf32>
    %97 = vector.extract_strided_slice %90 {offsets = [0, 0], sizes = [2, 32], strides = [1, 1]} : vector<2x96xf32> to vector<2x32xf32>
    %98 = vector.extract_strided_slice %96 {offsets = [0, 0], sizes = [2, 32], strides = [1, 1]} : vector<2x96xf32> to vector<2x32xf32>
    %99 = arith.addf %97, %98 : vector<2x32xf32>
    %100 = arith.negf %99 : vector<2x32xf32>
    %101 = math.exp %100 : vector<2x32xf32>
    %cst_54 = arith.constant 1.000000e+00 : f32
    %102 = vector.broadcast %cst_54 : f32 to vector<2x32xf32>
    %103 = arith.addf %102, %101 : vector<2x32xf32>
    %104 = arith.divf %102, %103 : vector<2x32xf32>
    %105 = vector.extract_strided_slice %90 {offsets = [0, 32], sizes = [2, 32], strides = [1, 1]} : vector<2x96xf32> to vector<2x32xf32>
    %106 = vector.extract_strided_slice %96 {offsets = [0, 32], sizes = [2, 32], strides = [1, 1]} : vector<2x96xf32> to vector<2x32xf32>
    %107 = arith.addf %105, %106 : vector<2x32xf32>
    %108 = arith.negf %107 : vector<2x32xf32>
    %109 = math.exp %108 : vector<2x32xf32>
    %cst_55 = arith.constant 1.000000e+00 : f32
    %110 = vector.broadcast %cst_55 : f32 to vector<2x32xf32>
    %111 = arith.addf %110, %109 : vector<2x32xf32>
    %112 = arith.divf %110, %111 : vector<2x32xf32>
    %113 = vector.extract_strided_slice %90 {offsets = [0, 64], sizes = [2, 32], strides = [1, 1]} : vector<2x96xf32> to vector<2x32xf32>
    %114 = vector.extract_strided_slice %96 {offsets = [0, 64], sizes = [2, 32], strides = [1, 1]} : vector<2x96xf32> to vector<2x32xf32>
    %115 = arith.mulf %104, %114 : vector<2x32xf32>
    %116 = arith.addf %113, %115 : vector<2x32xf32>
    %117 = math.tanh %116 : vector<2x32xf32>
    %cst_56 = arith.constant 1.000000e+00 : f32
    %118 = vector.broadcast %cst_56 : f32 to vector<2x32xf32>
    %119 = arith.subf %118, %112 : vector<2x32xf32>
    %120 = arith.mulf %119, %117 : vector<2x32xf32>
    %121 = arith.mulf %112, %85 : vector<2x32xf32>
    %122 = arith.addf %120, %121 : vector<2x32xf32>
    %c1_57 = arith.constant 1 : index
    %c0_58 = arith.constant 0 : index
    %c0_59 = arith.constant 0 : index
    %123 = vector.load %arg18[%c1_57, %c0_58, %c0_59] : memref<2x2x32xf32, #tpu.memory_space<vmem>>, vector<1x2x32xf32>
    %124 = vector.shape_cast %123 : vector<1x2x32xf32> to vector<2x32xf32>
    %125 = vector.shape_cast %122 : vector<2x32xf32> to vector<1x2x32xf32>
    tpu.vector_store %arg18[%c1_57, %c0_58, %c0_59], %125 {strides = array<i32>} : memref<2x2x32xf32, #tpu.memory_space<vmem>>, vector<1x2x32xf32>,
    %126 = arith.truncf %122 : vector<2x32xf32> to vector<2x32xbf16>
    %c0_60 = arith.constant 0 : index
    %c0_61 = arith.constant 0 : index
    %127 = vector.load %arg15[%c0_60, %c0_61] : memref<32x128xbf16, #tpu.memory_space<vmem>>, vector<32x128xbf16>
    %cst_62 = arith.constant dense<0.000000e+00> : vector<2x128xf32>
    %128 = tpu.matmul %126, %127, %cst_62 {dimension_numbers = #tpu.dot_dimension_numbers<[1], [0], [0], [1], [0, 0, 1, 1], [], []>} : vector<2x32xbf16>, vector<32x128xbf16>, vector<2x128xf32> -> vector<2x128xf32>
    %c0_63 = arith.constant 0 : index
    %c0_64 = arith.constant 0 : index
    %129 = vector.load %arg16[%c0_63, %c0_64] : memref<1x128xf32, #tpu.memory_space<vmem>>, vector<1x128xf32>
    %130 = vector.broadcast %129 : vector<1x128xf32> to vector<2x128xf32>
    %131 = arith.addf %128, %130 : vector<2x128xf32>
    %cst_65 = arith.constant dense<0xFF800000> : vector<2xf32>
    %132 = vector.multi_reduction <maximumf>, %131, %cst_65 [1] : vector<2x128xf32> to vector<2xf32>
    %133 = vector.shape_cast %132 : vector<2xf32> to vector<2x1xf32>
    %134 = vector.broadcast %133 : vector<2x1xf32> to vector<2x128xf32>
    %135 = arith.subf %131, %134 : vector<2x128xf32>
    %136 = math.exp %135 : vector<2x128xf32>
    %cst_66 = arith.constant dense<0.000000e+00> : vector<2xf32>
    %137 = vector.multi_reduction <add>, %136, %cst_66 [1] : vector<2x128xf32> to vector<2xf32>
    %138 = vector.shape_cast %137 : vector<2xf32> to vector<2x1xf32>
    %139 = math.log %138 : vector<2x1xf32>
    %140 = arith.addf %133, %139 : vector<2x1xf32>
    %141 = vector.broadcast %140 : vector<2x1xf32> to vector<2x128xf32>
    %142 = arith.subf %131, %141 : vector<2x128xf32>
    %c0_67 = arith.constant 0 : index
    %c0_68 = arith.constant 0 : index
    %143 = vector.load %arg17[%c0_67, %c0_68] : memref<2x128xf32, #tpu.memory_space<vmem>>, vector<2x128xf32>
    tpu.vector_store %arg17[%c0_67, %c0_68], %142 {strides = array<i32>} : memref<2x128xf32, #tpu.memory_space<vmem>>, vector<2x128xf32>,
    return
  }
}

</mosaic_0001>

<bundles_post_ra>
// kernel: decoder_forward.1
= control target key start
LH: loop header
LB: loop body
LE: loop exit
PB: predicated region body
PF: predicated region fallthrough
CT: control target
= control target key end

     0   :  { %s2237_s0 = inlined_call_operand.vmem [shape: bf16[8,2,32], index: 0, kind: input, shape index: {}]   ;;  %s2238_s1 = inlined_call_operand.vmem [shape: bf16[2,16], index: 1, kind: input, shape index: {}]   ;;  %s2239_s2 = inlined_call_operand.vmem [shape: f32[2,2,32], index: 2, kind: input, shape index: {}]   ;;  %s2240_s3 = inlined_call_operand.vmem [shape: bf16[32,32], index: 3, kind: input, shape index: {}]   ;;  %s2241_s4 = inlined_call_operand.vmem [shape: bf16[32,32], index: 4, kind: input, shape index: {}]   ;;  %s2242_s5 = inlined_call_operand.vmem [shape: f32[1,32], index: 5, kind: input, shape index: {}]   ;;  %s2243_s6 = inlined_call_operand.vmem [shape: bf16[32,1], index: 6, kind: input, shape index: {}]   ;;  %s2244_s7 = inlined_call_operand.vmem [shape: bf16[48,96], index: 7, kind: input, shape index: {}]   ;;  %s2245_s8 = inlined_call_operand.vmem [shape: bf16[32,96], index: 8, kind: input, shape index: {}]   ;;  %s2246_s9 = inlined_call_operand.vmem [shape: f32[1,96], index: 9, kind: input, shape index: {}]   ;;  %s2247_s10 = inlined_call_operand.hbm [shape: f32[1,96], index: 10, kind: input, shape index: {}]   ;;  %s2248_s11 = inlined_call_operand.vmem [shape: bf16[32,96], index: 11, kind: input, shape index: {}]   ;;  %s2249_s12 = inlined_call_operand.vmem [shape: bf16[32,96], index: 12, kind: input, shape index: {}]   ;;  %s2250_s13 = inlined_call_operand.hbm [shape: f32[1,96], index: 13, kind: input, shape index: {}]   ;;  %s2251_s14 = inlined_call_operand.hbm [shape: f32[1,96], index: 14, kind: input, shape index: {}]   ;;  %s2252_s15 = inlined_call_operand.hbm [shape: bf16[32,128], index: 15, kind: input, shape index: {}]   ;;  %s2253_s16 = inlined_call_operand.vmem [shape: f32[1,128], index: 16, kind: input, shape index: {}]   ;;  %s2254_s17 = inlined_call_operand.vmem [shape: f32[2,128], index: 17, kind: output, shape index: {0}]   ;;  %s2255_s18 = inlined_call_operand.hbm [shape: f32[2,2,32], index: 18, kind: output, shape index: {1}]   ;;  %s2256_s19 = inlined_call_operand.hbm [shape: f32[2,128], index: 19, kind: output, shape index: {2}]  }
   0x1   :  { %2260 = sst [smem:[#allocation18_spill]] %s2237_s0 }
   0x2   :  { %2261 = sst [smem:[#allocation19_spill]] %s2238_s1 }
   0x3   :  { %2262 = sst [smem:[#allocation20_spill]] %s2239_s2 }
   0x4   :  { %2263 = sst [smem:[#allocation21_spill]] %s2240_s3 }
   0x5   :  { %25 = vsyncpa [#allocation3], 0 }
   0x6   :  { %26 = vsyncpa [#allocation6], 0 }
   0x7   :  { %27 = vsyncpa [#allocation9], 0 }
   0x8   :  { %28 = vsyncpa [#allocation4], 0 }
   0x9   :  { %29 = vsyncpa [#allocation12], 0  ;;  %s1743_s0 = smov [#allocation5]   ;;  %s1744_s20 = smov [#allocation2]  }
   0xa   :  { %s70_s30 = sshll.u32 %s1743_s0, 4  ;;  %s56_s21 = sshll.u32 %s1744_s20, 4  ;;  %s71_s30 = int_to_ptr.vmem [resolvable:$true] %s70_s30  ;;  %s57_s21 = int_to_ptr.vmem [resolvable:$true] %s56_s21 }
   0xb   :  { %s1601_s2 = scalar_lea.hbm %s2250_s13, 16 }
   0xc   :  { %p1602_p0 = scmp.ne.s32.totalorder %s2250_s13, %s1601_s2  ;;  %p1605_p1 = scmp.lt.u32.totalorder %s1601_s2, %s2250_s13 }
   0xe   :  { %p1607_p2 = pnand %p1605_p1, %p1602_p0 }
  0x10   :  { %1610 = shalt.err (!%p1607_p2)
}
  0x11   :  { %s1611_s26 = scalar_lea.vmem %s71_s30, 16  ;;  %s1615_s27 = scalar_lea.vmem %s71_s30, 32 }
  0x12   :  { %p1612_p3 = scmp.ne.s32.totalorder %s71_s30, %s1611_s26  ;;  %p1616_p4 = scmp.lt.s32.totalorder %s71_s30, %s71_s30 }
  0x13   :  { %p1617_p5 = scmp.lt.s32.totalorder %s1615_s27, %s1611_s26 }
  0x15   :  { %p1618_p6 = por %p1617_p5, %p1616_p4 }
  0x17   :  { %p1619_p7 = pnand %p1618_p6, %p1612_p3 }
  0x19   :  { %1622 = shalt.err (!%p1619_p7)
}
  0x1a   :  { %73 = dma.hbm_to_vmem [thread:$0]  %s2250_s13, 16, %s71_s30, [#allocation6]  }
  0x1b   :  { %s1623_s1 = scalar_lea.hbm %s2247_s10, 16 }
  0x1c   :  { %p1624_p8 = scmp.ne.s32.totalorder %s2247_s10, %s1623_s1  ;;  %p1627_p9 = scmp.lt.u32.totalorder %s1623_s1, %s2247_s10 }
  0x1e   :  { %p1629_p10 = pnand %p1627_p9, %p1624_p8 }
  0x20   :  { %1632 = shalt.err (!%p1629_p10)
}
  0x21   :  { %s1633_s25 = scalar_lea.vmem %s57_s21, 16  ;;  %s1637_s3 = scalar_lea.vmem %s57_s21, 32 }
  0x22   :  { %p1634_p11 = scmp.ne.s32.totalorder %s57_s21, %s1633_s25  ;;  %p1638_p12 = scmp.lt.s32.totalorder %s57_s21, %s57_s21 }
  0x23   :  { %p1639_p13 = scmp.lt.s32.totalorder %s1637_s3, %s1633_s25 }
  0x25   :  { %p1640_p0 = por %p1639_p13, %p1638_p12 }
  0x27   :  { %p1641_p1 = pnand %p1640_p0, %p1634_p11 }
  0x29   :  { %1644 = shalt.err (!%p1641_p1)
}
  0x2a   :  { %59 = dma.hbm_to_vmem [thread:$0]  %s2247_s10, 16, %s57_s21, [#allocation3]  }
  0x2b   :  { %s1745_s26 = smov [#allocation7]   ;;  %s1746_s28 = smov [#allocation8]  }
  0x2c   :  { %s80_s27 = sshll.u32 %s1745_s26, 4  ;;  %s89_s29 = sshll.u32 %s1746_s28, 4  ;;  %s81_s27 = int_to_ptr.vmem [resolvable:$true] %s80_s27  ;;  %s1885_s29 = int_to_ptr.vmem [resolvable:$true] %s89_s29 }
  0x2d   :  { %s1645_s1 = scalar_lea.hbm %s2251_s14, 16 }
  0x2e   :  { %p1646_p2 = scmp.ne.s32.totalorder %s2251_s14, %s1645_s1  ;;  %p1649_p3 = scmp.lt.u32.totalorder %s1645_s1, %s2251_s14 }
  0x30   :  { %p1651_p4 = pnand %p1649_p3, %p1646_p2 }
  0x32   :  { %1654 = shalt.err (!%p1651_p4)
}
  0x33   :  { %s1655_s10 = scalar_lea.vmem %s81_s27, 16  ;;  %s1659_s21 = scalar_lea.vmem %s81_s27, 32 }
  0x34   :  { %p1656_p5 = scmp.ne.s32.totalorder %s81_s27, %s1655_s10  ;;  %p1660_p6 = scmp.lt.s32.totalorder %s81_s27, %s81_s27 }
  0x35   :  { %p1661_p7 = scmp.lt.s32.totalorder %s1659_s21, %s1655_s10 }
  0x37   :  { %p1662_p8 = por %p1661_p7, %p1660_p6 }
  0x39   :  { %p1663_p9 = pnand %p1662_p8, %p1656_p5 }
  0x3b   :  { %1666 = shalt.err (!%p1663_p9)
}
  0x3c   :  { %83 = dma.hbm_to_vmem [thread:$0]  %s2251_s14, 16, %s81_s27, [#allocation6]  }
  0x3d   :  { %s1667_s26 = scalar_lea.hbm %s2252_s15, 256 }
  0x3e   :  { %p1668_p10 = scmp.ne.s32.totalorder %s2252_s15, %s1667_s26  ;;  %p1671_p11 = scmp.lt.u32.totalorder %s1667_s26, %s2252_s15 }
  0x40   :  { %p1673_p12 = pnand %p1671_p11, %p1668_p10 }
  0x42   :  { %1676 = shalt.err (!%p1673_p12)
}
  0x43   :  { %s1677_s22 = scalar_lea.vmem %s1885_s29, 256  ;;  %p1682_p0 = scmp.lt.s32.totalorder %s1885_s29, %s1885_s29 }
  0x44   :  { %p1678_p13 = scmp.ne.s32.totalorder %s1885_s29, %s1677_s22  ;;  %p1683_p1 = scmp.lt.s32.totalorder %s1677_s22, %s1677_s22 }
  0x46   :  { %p1684_p2 = por %p1683_p1, %p1682_p0 }
  0x48   :  { %p1685_p3 = pnand %p1684_p2, %p1678_p13 }
  0x4a   :  { %1688 = shalt.err (!%p1685_p3)
}
  0x4b   :  { %s1747_s14 = smov 64   ;;  %s1748_s27 = smov 4  }
  0x4c   :  { %95 = dma.hbm_to_vmem [thread:$0]  %s2252_s15, 256, %s1885_s29, [#allocation9], %s1747_s14, %s1747_s14, %s1748_s27  }
  0x4d   :  { %1733 = dma.done.wait [#allocation3], 16  }
  0x4e   :  { %1734 = vsyncadd [#allocation3], 4294967280 }
  0x4f   :  { %1735 = dma.done.wait [#allocation6], 32  }
  0x50   :  { %1736 = vsyncadd [#allocation6], 4294967264 }
  0x51   :  { %1737 = dma.done.wait [#allocation9], 256  }
  0x52   :  { %1738 = vsyncadd [#allocation9], 4294967040  ;;  %v1749_v0 = vmov 0.0   ;;  %vm1750_vm0 = vmmov 0   ;;  %v1751_v1 = vmov 1966171168   ;;  %v201_v3 = vlaneseq }
  0x53   :  { %1448 = vmatprep.subr.bf16.mxu0 %v1749_v0  ;;  %1456 = vmatprep.subr.bf16.mxu1 %v1749_v0  ;;  %v199_v2 = vunpack.c.l.s4 %v1751_v1  ;;  %v1534_v6 = vld [vmem:[%s2241_s4] sm:$0xff]   ;;  %s2264_s21 = sld [smem:[#allocation21_spill]]  ;;  %v1536_v8 = vld [vmem:[%s2241_s4 + $0x8] sm:$0xff]   ;;  %vm142_vm1 = vcmask 261120   ;;  %s2265_s0 = sld [smem:[#allocation20_spill]]  ;;  %vm546_vm2 = vcmask 1024  }
  0x54   :  { %1452 = vmatprep.mubr.msk.bf16.mxu0 %vm1750_vm0, %v1749_v0  ;;  %1460 = vmatprep.mubr.msk.bf16.mxu1 %vm1750_vm0, %v1749_v0  ;;  %v1925_v5 = vshrl.u32 %v201_v3, 7  ;;  %s2266_s4 = sld [smem:[#allocation18_spill]]  ;;  %v1538_v34 = vld [vmem:[%s2243_s6] sm:$0xff]   ;;  %v1539_v35 = vld [vmem:[%s2243_s6 + $0x8] sm:$0xff]   ;;  %v1752_v36 = vmov 1983009808  }
  0x55   :  { %v200_v4 = vunpack.c.0.s8 %v199_v2  ;;  %1449 = vmatpush3.bf16.msra.mxu0 %v1534_v6  ;;  %v258_v37 = vunpack.c.l.s4 %v1752_v36  ;;  %v1391_v50 = vld [vmem:[%s2242_s5] ss:$0 sm:$0xff]  ;;  %vm722_vm3 = vcmask 254976   ;;  %s2267_s26 = sld [smem:[#allocation19_spill]]  ;;  %vm907_vm4 = vcmask 130048   ;;  %s1756_s1 = smov 32  }
  0x56   :  { %1450 = vmatprep.subr.bf16.mxu0 %v1749_v0  ;;  %vm943_vm5 = vcmask 392192   ;;  %s1757_s24 = smov 96   ;;  %vm1332_vm6 = vcmask 1041408   ;;  %vm852_vm7 = vcmask 1041409   ;;  %vm854_vm8 = vcmask 1042434  }
  0x57   :  { %v1941_v10 = vsub.s32 %v200_v4, %v1925_v5  ;;  %v259_v38 = vunpack.c.0.s8 %v258_v37  ;;  %vm856_vm9 = vcmask 1043459   ;;  %vm858_vm10 = vcmask 1044484  }
  0x58   :  { %vm860_vm11 = vcmask 1045509   ;;  %vm862_vm12 = vcmask 1046534   ;;  %vm864_vm13 = vcmask 1047559   ;;  %vm899_vm14 = vcmask 64512  }
  0x59   :  { %v1535_v7 = vld [vmem:[%s2264_s21] sm:$0xff]   ;;  %v1537_v9 = vld [vmem:[%s2264_s21 + $0x8] sm:$0xff]   ;;  %1451 = vmatpush3.bf16.msra.mxu0 %v1536_v8  ;;  %v2018_v39 = vsub.s32 %v259_v38, %v1925_v5 }
  0x5a   :  { %1457 = vmatpush3.bf16.msra.mxu1 %v1535_v7  ;;  %v1384_v11 = vld [vmem:[%s2265_s0 + $0x2] sm:$0x3]  ;;  %v1950_v12 = vld [vmem:[%s2266_s4] sm:$0x1]  ;;  %v1955_v13 = vld [vmem:[%s2266_s4 + $0x1] sm:$0x1]  ;;  %1464 = vmatprep.subr.bf16.mxu0 %v1749_v0 }
  0x5b   :  { %1458 = vmatprep.subr.bf16.mxu1 %v1749_v0  ;;  %v125_v14 = vpack.c.bf16 %v1384_v11, %v1384_v11  ;;  %v1960_v15 = vld [vmem:[%s2266_s4 + $0x2] sm:$0x1]  ;;  %v1965_v16 = vld [vmem:[%s2266_s4 + $0x3] sm:$0x1]  ;;  %v1970_v17 = vld [vmem:[%s2266_s4 + $0x4] sm:$0x1]  ;;  %v194_v18 = vcombine.low %v1950_v12, %v1955_v13 }
  0x5c   :  { %v1977_v19 = vld [vmem:[%s2266_s4 + $0x5] sm:$0x1]  ;;  %v1982_v20 = vld [vmem:[%s2266_s4 + $0x6] sm:$0x1]  ;;  %v1987_v21 = vld [vmem:[%s2266_s4 + $0x7] sm:$0x1]  ;;  %v195_v22 = vcombine.low %v1960_v15, %v1965_v16 }
  0x5d   :  { %v196_v23 = vcombine.low %v1970_v17, %v1977_v19  ;;  %v197_v24 = vcombine.low %v1982_v20, %v1987_v21  ;;  %v204_v25 = vrot.slane %v194_v18, %v1941_v10  ;;  %1453 = vmatmul.mubr.msk.bf16.vlgmr.msra.gmra.mrb[0].mxu0 %vm142_vm1, %v125_v14 }
  0x5e   :  { %1459 = vmatpush3.bf16.msra.mxu1 %v1537_v9  ;;  %v211_v26 = vrot.slane %v195_v22, %v1941_v10  ;;  %1468 = vmatprep.mubr.msk.bf16.mxu0 %vm1750_vm0, %v1749_v0 }
  0x5f   :  { %1472 = vmatprep.subr.bf16.mxu1 %v1749_v0  ;;  %v218_v27 = vrot.slane %v196_v23, %v1941_v10  ;;  %v225_v28 = vrot.slane %v197_v24, %v1941_v10  ;;  %1465 = vmatpush3.bf16.msra.mxu0 %v1538_v34 }
  0x60   :  { %v226_v29 = vcombine.low %v204_v25, %v211_v26  ;;  %1466 = vmatprep.subr.bf16.mxu0 %v1749_v0 }
  0x61   :  { %v227_v30 = vcombine.low %v218_v27, %v225_v28 }
  0x62   :  { %v234_v31 = vrot.slane %v226_v29, %v1941_v10 }
  0x63   :  { %v241_v32 = vrot.slane %v227_v30, %v1941_v10  ;;  %1467 = vmatpush3.bf16.msra.mxu0 %v1539_v35 }
  0x64   :  { %1482 = vmatprep.subr.bf16.mxu0 %v1749_v0 }
  0x65   :  { %v242_v33 = vcombine.low %v234_v31, %v241_v32 }
  0x67   :  { %1461 = vmatmul.mubr.msk.bf16.vlgmr.msra.gmra.mrb[0].mxu1 %vm142_vm1, %v242_v33 }
  0x68   :  { %1478 = vmatprep.mubr.msk.bf16.mxu1 %vm1750_vm0, %v1749_v0 }
 0x130   :  { %v180_v40 = vpop.f32.mrb[0].mxu0 }
 0x131   :  { %v256_v41 = vcombine.low %v180_v40, %v180_v40  ;;  %v1454_v42 = vpop.f32.mrb[1].mxu0 }
 0x132   :  { %v183_v43 = vpop.f32.mrb[2].mxu0  ;;  %v1753_v42 = vmov 0  }
 0x133   :  { %v263_v44 = vrot.slane %v256_v41, %v2018_v39  ;;  %v1455_v45 = vpop.f32.mrb[3].mxu0  ;;  %1533 = vset.pattern.permute.xlu1 %v1753_v42  ;;  %1532 = vset.pattern.permute.xlu0 %v1753_v42 }
 0x135   :  { %v264_v46 = vcombine.low %v263_v44, %v263_v44 }
 0x13a   :  { %v303_v47 = vpop.f32.mrb[0].mxu1 }
 0x13b   :  { %v304_v48 = vadd.f32 %v303_v47, %v264_v46  ;;  %v1462_v49 = vpop.f32.mrb[1].mxu1 }
 0x13c   :  { %v306_v51 = vpop.f32.mrb[2].mxu1 }
 0x13d   :  { %v312_v52 = vcombine.high %v304_v48, %v304_v48  ;;  %v319_v53 = vrot.slane %v304_v48, %v2018_v39  ;;  %v307_v54 = vadd.f32 %v306_v51, %v264_v46  ;;  %v1463_v55 = vpop.f32.mrb[3].mxu1 }
 0x13f   :  { %v326_v56 = vrot.slane %v312_v52, %v2018_v39  ;;  %v327_v57 = vcombine.high %v319_v53, %v319_v53  ;;  %v361_v58 = vadd.f32 %v1391_v50, %v319_v53  ;;  %v329_v59 = vcombine.high %v307_v54, %v307_v54 }
 0x140   :  { %v336_v60 = vrot.slane %v307_v54, %v2018_v39 }
 0x141   :  { %v328_v61 = vcombine.high %v326_v56, %v326_v56  ;;  %v362_v62 = vadd.f32 %v1391_v50, %v327_v57  ;;  %v363_v63 = vadd.f32 %v1391_v50, %v326_v56  ;;  %1551 = vtanh.f32 %v361_v58 }
 0x142   :  { %v343_v1 = vrot.slane %v329_v59, %v2018_v39  ;;  %v344_v2 = vcombine.high %v336_v60, %v336_v60  ;;  %v365_v4 = vadd.f32 %v1391_v50, %v336_v60 }
 0x143   :  { %v364_v6 = vadd.f32 %v1391_v50, %v328_v61  ;;  %1553 = vtanh.f32 %v362_v62 }
 0x144   :  { %1555 = vtanh.f32 %v363_v63  ;;  %v345_v7 = vcombine.high %v343_v1, %v343_v1  ;;  %v366_v8 = vadd.f32 %v1391_v50, %v344_v2  ;;  %v367_v9 = vadd.f32 %v1391_v50, %v343_v1 }
 0x145   :  { %1557 = vtanh.f32 %v364_v6 }
 0x146   :  { %v368_v11 = vadd.f32 %v1391_v50, %v345_v7  ;;  %1559 = vtanh.f32 %v365_v4 }
 0x147   :  { %1561 = vtanh.f32 %v366_v8 }
 0x148   :  { %1563 = vtanh.f32 %v367_v9 }
 0x149   :  { %1565 = vtanh.f32 %v368_v11 }
 0x14b   :  { %v1552_v14 = vpop.eup %1551 }
 0x14d   :  { %v1554_v18 = vpop.eup %1553 }
 0x14e   :  { %v1556_v22 = vpop.eup %1555  ;;  %v1392_v23 = vpack.c.bf16 %v1554_v18, %v1552_v14 }
 0x14f   :  { %v1558_v24 = vpop.eup %1557 }
 0x150   :  { %v1560_v25 = vpop.eup %1559  ;;  %v1393_v26 = vpack.c.bf16 %v1558_v24, %v1556_v22  ;;  %v407_v30 = vrot.slane %v1392_v23, %v1941_v10 }
 0x151   :  { %v1562_v27 = vpop.eup %1561 }
 0x152   :  { %v1564_v28 = vpop.eup %1563  ;;  %v1394_v29 = vpack.c.bf16 %v1562_v27, %v1560_v25  ;;  %v414_v31 = vrot.slane %v1393_v26, %v1941_v10 }
 0x153   :  { %v1566_v32 = vpop.eup %1565 }
 0x154   :  { %v1395_v33 = vpack.c.bf16 %v1566_v32, %v1564_v28  ;;  %v429_v34 = vcombine.low %v407_v30, %v414_v31  ;;  %v421_v35 = vrot.slane %v1394_v29, %v1941_v10 }
 0x156   :  { %v428_v36 = vrot.slane %v1395_v33, %v1941_v10  ;;  %v437_v38 = vrot.slane %v429_v34, %v1941_v10 }
 0x158   :  { %v430_v37 = vcombine.low %v421_v35, %v428_v36 }
 0x15a   :  { %v444_v40 = vrot.slane %v430_v37, %v1941_v10 }
 0x15c   :  { %v445_v41 = vcombine.low %v437_v38, %v444_v40 }
 0x15e   :  { %1469 = vmatmul.mubr.msk.bf16.vlgmr.msra.gmra.mrb[4].mxu0 %vm142_vm1, %v445_v41 }
 0x15f   :  { %1486 = vmatprep.mubr.msk.bf16.mxu0 %vm1750_vm0, %v1749_v0 }
 0x231   :  { %v495_v43 = vpop.f32.mrb[4].mxu0 }
 0x232   :  { %v504_v44 = vcombine.high %v495_v43, %v495_v43  ;;  %v511_v45 = vrot.slane %v495_v43, %v2018_v39  ;;  %v1470_v46 = vpop.f32.mrb[5].mxu0 }
 0x233   :  { %v498_v47 = vpop.f32.mrb[6].mxu0 }
 0x234   :  { %v518_v48 = vrot.slane %v504_v44, %v2018_v39  ;;  %v521_v49 = vcombine.high %v498_v47, %v498_v47  ;;  %v1471_v10 = vpop.f32.mrb[7].mxu0  ;;  %v519_v50 = vcombine.high %v511_v45, %v511_v45  ;;  %v528_v51 = vrot.slane %v498_v47, %v2018_v39 }
 0x235   :  { %v547_v54 = vsel %vm546_vm2, %v511_v45, -inf }
 0x236   :  { %v520_v52 = vcombine.high %v518_v48, %v518_v48  ;;  %v535_v53 = vrot.slane %v521_v49, %v2018_v39  ;;  %v536_v55 = vcombine.high %v528_v51, %v528_v51  ;;  %v551_v56 = vsel %vm546_vm2, %v528_v51, -inf }
 0x237   :  { %v549_v57 = vsel %vm546_vm2, %v518_v48, -inf  ;;  %v552_v59 = vmax.f32 %v547_v54, %v551_v56  ;;  %v548_v61 = vsel %vm546_vm2, %v519_v50, -inf }
 0x238   :  { %v537_v58 = vcombine.high %v535_v53, %v535_v53  ;;  %v555_v60 = vsel %vm546_vm2, %v535_v53, -inf  ;;  %v553_v62 = vsel %vm546_vm2, %v536_v55, -inf  ;;  %v550_v1 = vsel %vm546_vm2, %v520_v52, -inf }
 0x239   :  { %v556_v63 = vmax.f32 %v549_v57, %v555_v60  ;;  %v554_v2 = vmax.f32 %v548_v61, %v553_v62 }
 0x23a   :  { %v557_v4 = vsel %vm546_vm2, %v537_v58, -inf }
 0x23b   :  { %v558_v6 = vmax.f32 %v550_v1, %v557_v4  ;;  %v559_v7 = vmax.f32 %v552_v59, %v554_v2 }
 0x23d   :  { %v560_v8 = vmax.f32 %v556_v63, %v558_v6  ;;  %v1540_v6 = vld [vmem:[%s2245_s8] sm:$0xff]  }
 0x23e   :  { %1483 = vmatpush3.bf16.msra.mxu0 %v1540_v6 }
 0x23f   :  { %v561_v9 = vmax.f32 %v559_v7, %v560_v8  ;;  %v1542_v7 = vld [vmem:[%s2244_s7] sm:$0xff]   ;;  %v1541_v8 = vld [vmem:[%s2245_s8 + $0x8] sm:$0xff]   ;;  %1484 = vmatprep.subr.bf16.mxu0 %v1749_v0 }
 0x240   :  { %1473 = vmatpush3.bf16.msra.mxu1 %v1542_v7 }
 0x241   :  { %v566_v11 = vsub.f32 %v528_v51, %v561_v9  ;;  %v567_v14 = vsub.f32 %v536_v55, %v561_v9  ;;  %v568_v18 = vsub.f32 %v535_v53, %v561_v9  ;;  %v569_v22 = vsub.f32 %v537_v58, %v561_v9  ;;  %1474 = vmatprep.subr.bf16.mxu1 %v1749_v0 }
 0x242   :  { %v562_v23 = vsub.f32 %v511_v45, %v561_v9  ;;  %v563_v24 = vsub.f32 %v519_v50, %v561_v9  ;;  %v564_v25 = vsub.f32 %v518_v48, %v561_v9  ;;  %v565_v26 = vsub.f32 %v520_v52, %v561_v9  ;;  %v2093_v9 = vld [vmem:[%s2265_s0] sm:$0x3]  ;;  %1485 = vmatpush3.bf16.msra.mxu0 %v1541_v8 }
 0x243   :  { %v578_v31 = vmul.f32 1.442695, %v566_v11  ;;  %v580_v32 = vmul.f32 1.442695, %v567_v14  ;;  %v582_v33 = vmul.f32 1.442695, %v568_v18  ;;  %v986_v14 = vpack.c.bf16 %v2093_v9, %v2093_v9  ;;  %1498 = vmatprep.subr.bf16.mxu0 %v1749_v0 }
 0x244   :  { %v570_v27 = vmul.f32 1.442695, %v562_v23  ;;  %v572_v28 = vmul.f32 1.442695, %v563_v24  ;;  %v574_v29 = vmul.f32 1.442695, %v564_v25 }
 0x245   :  { %v576_v30 = vmul.f32 1.442695, %v565_v26  ;;  %v584_v34 = vmul.f32 1.442695, %v569_v22  ;;  %v1543_v11 = vld [vmem:[%s2244_s7 + $0x8] sm:$0xff]   ;;  %v1544_v18 = vld [vmem:[%s2244_s7 + $0x10] sm:$0xff]   ;;  %1487 = vmatmul.mubr.msk.bf16.vlgmr.msra.gmra.mrb[8].mxu0 %vm142_vm1, %v986_v14 }
 0x246   :  { %1567 = vpow2.f32 %v570_v27  ;;  %1475 = vmatpush3.bf16.msra.mxu1 %v1543_v11  ;;  %1502 = vmatprep.mubr.msk.bf16.mxu0 %vm1750_vm0, %v1749_v0  ;;  %v1754_v22 = vmov 269488144   ;;  %v610_v27 = vunpack.c.l.bf16 %v1950_v12  ;;  %s1755_s7 = smov 16  }
 0x247   :  { %1569 = vpow2.f32 %v572_v28  ;;  %1476 = vmatprep.subr.bf16.mxu1 %v1749_v0  ;;  %v624_v23 = vunpack.c.l.s4 %v1754_v22 }
 0x248   :  { %1571 = vpow2.f32 %v574_v29 }
 0x249   :  { %1573 = vpow2.f32 %v576_v30  ;;  %v625_v24 = vunpack.c.0.s8 %v624_v23  ;;  %v612_v30 = vunpack.c.l.bf16 %v1960_v15  ;;  %v1404_v23 = vld [vmem:[#allocation2] ss:$0 sm:$0xff] }
 0x24a   :  { %1575 = vpow2.f32 %v578_v31  ;;  %1477 = vmatpush3.bf16.msra.mxu1 %v1544_v18 }
 0x24b   :  { %1577 = vpow2.f32 %v580_v32  ;;  %1490 = vmatprep.subr.bf16.mxu1 %v1749_v0  ;;  %v628_v25 = vsub.s32 %v625_v24, %v1925_v5  ;;  %v611_v32 = vunpack.c.l.bf16 %v1955_v13 }
 0x24c   :  { %1579 = vpow2.f32 %v582_v33 }
 0x24d   :  { %1581 = vpow2.f32 %v584_v34 }
 0x250   :  { %v1568_v35 = vpop.eup %1567 }
 0x251   :  { %v1570_v36 = vpop.eup %1569  ;;  %v586_v37 = vsel %vm546_vm2, %v1568_v35, 0.0 }
 0x252   :  { %v1572_v38 = vpop.eup %1571  ;;  %v587_v40 = vsel %vm546_vm2, %v1570_v36, 0.0 }
 0x253   :  { %v1574_v41 = vpop.eup %1573  ;;  %v588_v42 = vadd.f32 %v587_v40, %v586_v37  ;;  %v589_v43 = vsel %vm546_vm2, %v1572_v38, 0.0 }
 0x254   :  { %v1576_v44 = vpop.eup %1575  ;;  %v591_v46 = vsel %vm546_vm2, %v1574_v41, 0.0 }
 0x255   :  { %v590_v45 = vadd.f32 %v589_v43, %v588_v42  ;;  %v1578_v47 = vpop.eup %1577  ;;  %v593_v49 = vsel %vm546_vm2, %v1576_v44, 0.0  ;;  %v614_v42 = vunpack.c.l.bf16 %v1970_v17  ;;  %v615_v43 = vunpack.c.l.bf16 %v1977_v19 }
 0x256   :  { %v1580_v10 = vpop.eup %1579  ;;  %v595_v51 = vsel %vm546_vm2, %v1578_v47, 0.0  ;;  %v617_v17 = vunpack.c.l.bf16 %v1987_v21 }
 0x257   :  { %v592_v48 = vadd.f32 %v591_v46, %v590_v45  ;;  %v1582_v52 = vpop.eup %1581  ;;  %v597_v54 = vsel %vm546_vm2, %v1580_v10, 0.0 }
 0x258   :  { %v599_v56 = vsel %vm546_vm2, %v1582_v52, 0.0 }
 0x259   :  { %v594_v50 = vadd.f32 %v593_v49, %v592_v48 }
 0x25b   :  { %v596_v53 = vadd.f32 %v595_v51, %v594_v50 }
 0x25d   :  { %v598_v55 = vadd.f32 %v597_v54, %v596_v53 }
 0x25f   :  { %v600_v57 = vadd.f32 %v599_v56, %v598_v55 }
 0x261   :  { %1583 = vrcp.f32 %v600_v57 }
 0x26b   :  { %v1584_v58 = vpop.eup %1583 }
 0x26c   :  { %v2057_v59 = vmul.f32 %v1584_v58, %v1572_v38  ;;  %v2059_v60 = vmul.f32 %v1584_v58, %v1568_v35  ;;  %v2061_v61 = vmul.f32 %v1584_v58, %v1574_v41  ;;  %v2063_v62 = vmul.f32 %v1584_v58, %v1570_v36 }
 0x26d   :  { %v2065_v63 = vmul.f32 %v1584_v58, %v1578_v47  ;;  %v2067_v1 = vmul.f32 %v1584_v58, %v1576_v44  ;;  %v2069_v2 = vmul.f32 %v1584_v58, %v1582_v52  ;;  %v2071_v4 = vmul.f32 %v1584_v58, %v1580_v10 }
 0x26e   :  { %644 = vperm.xlu1 %1533, %v2057_v59   ;;  %620 = vperm.xlu0 %1532, %v2059_v60   ;;  %v613_v36 = vunpack.c.l.bf16 %v1965_v16  ;;  %v616_v10 = vunpack.c.l.bf16 %v1982_v20 }
 0x272   :  { %656 = vperm.xlu1 %1533, %v2061_v61   ;;  %632 = vperm.xlu0 %1532, %v2063_v62  }
 0x276   :  { %680 = vperm.xlu1 %1533, %v2065_v63   ;;  %668 = vperm.xlu0 %1532, %v2067_v1  }
 0x27a   :  { %704 = vperm.xlu1 %1533, %v2069_v2   ;;  %692 = vperm.xlu0 %1532, %v2071_v4  }
 0x2ed   :  { %v645_v26 = vpop.permute.xlu1 %644  ;;  %v621_v28 = vpop.permute.xlu0 %620 }
 0x2ee   :  { %v629_v29 = vrot.slane %v621_v28, %v628_v25  ;;  %v653_v31 = vrot.slane %v645_v26, %v628_v25 }
 0x2f0   :  { %v714_v33 = vmul.f32 %v629_v29, %v610_v27  ;;  %v716_v40 = vmul.f32 %v653_v31, %v612_v30  ;;  %v902_v29 = vld [vmem:[%s2267_s26] sm:$0x1] }
 0x2f1   :  { %v657_v34 = vpop.permute.xlu1 %656  ;;  %v633_v35 = vpop.permute.xlu0 %632 }
 0x2f2   :  { %v665_v37 = vrot.slane %v657_v34, %v628_v25  ;;  %v641_v38 = vrot.slane %v633_v35, %v628_v25  ;;  %v723_v12 = vsel %vm722_vm3, %v714_v33, 0.0  ;;  %v726_v16 = vsel %vm722_vm3, %v716_v40, 0.0 }
 0x2f4   :  { %v715_v41 = vmul.f32 %v641_v38, %v611_v32  ;;  %v717_v45 = vmul.f32 %v665_v37, %v613_v36  ;;  %v1399_v32 = vld [vmem:[%s2246_s9] ss:$0 sm:$0xff] }
 0x2f5   :  { %v681_v15 = vpop.permute.xlu1 %680  ;;  %v669_v44 = vpop.permute.xlu0 %668 }
 0x2f6   :  { %v724_v13 = vsel %vm722_vm3, %v715_v41, 0.0  ;;  %v689_v46 = vrot.slane %v681_v15, %v628_v25  ;;  %v677_v47 = vrot.slane %v669_v44, %v628_v25  ;;  %v728_v19 = vsel %vm722_vm3, %v717_v45, 0.0 }
 0x2f7   :  { %v725_v48 = vadd.f32 %v724_v13, %v723_v12  ;;  %v1545_v13 = vld [vmem:[%s2249_s12] sm:$0xff]  }
 0x2f8   :  { %v718_v49 = vmul.f32 %v677_v47, %v614_v42  ;;  %v719_v53 = vmul.f32 %v689_v46, %v615_v43  ;;  %v1547_v46 = vld [vmem:[%s2248_s11] sm:$0xff]   ;;  %1499 = vmatpush3.bf16.msra.mxu0 %v1545_v13  ;;  %v1546_v47 = vld [vmem:[%s2249_s12 + $0x8] sm:$0xff]  }
 0x2f9   :  { %v727_v50 = vadd.f32 %v726_v16, %v725_v48  ;;  %v705_v51 = vpop.permute.xlu1 %704  ;;  %v693_v52 = vpop.permute.xlu0 %692  ;;  %1500 = vmatprep.subr.bf16.mxu0 %v1749_v0  ;;  %v1548_v48 = vld [vmem:[%s2248_s11 + $0x8] sm:$0xff]  }
 0x2fa   :  { %v713_v54 = vrot.slane %v705_v51, %v628_v25  ;;  %v701_v55 = vrot.slane %v693_v52, %v628_v25  ;;  %v730_v57 = vsel %vm722_vm3, %v718_v49, 0.0  ;;  %v732_v7 = vsel %vm722_vm3, %v719_v53, 0.0 }
 0x2fb   :  { %v729_v56 = vadd.f32 %v728_v19, %v727_v50 }
 0x2fc   :  { %v720_v58 = vmul.f32 %v701_v55, %v616_v10  ;;  %v721_v8 = vmul.f32 %v713_v54, %v617_v17  ;;  %1501 = vmatpush3.bf16.msra.mxu0 %v1546_v47  ;;  %v1414_v54 = vld [vmem:[#allocation7] ss:$0 sm:$0xff] }
 0x2fd   :  { %v731_v6 = vadd.f32 %v730_v57, %v729_v56 }
 0x2fe   :  { %v734_v20 = vsel %vm722_vm3, %v720_v58, 0.0  ;;  %v736_v21 = vsel %vm722_vm3, %v721_v8, 0.0  ;;  %v1410_v8 = vld [vmem:[#allocation5] ss:$0 sm:$0xff] }
 0x2ff   :  { %v733_v11 = vadd.f32 %v732_v7, %v731_v6 }
 0x301   :  { %v735_v14 = vadd.f32 %v734_v20, %v733_v11 }
 0x303   :  { %v737_v18 = vadd.f32 %v736_v21, %v735_v14 }
 0x305   :  { %v903_v22 = vpack.c.bf16 %v737_v18, %v737_v18 }
 0x307   :  { %905 = vrot.lane.b32.xlu0 %v903_v22, %s1755_s7 }
 0x318   :  { %v1047_v24 = vpop.f32.mrb[8].mxu0 }
 0x319   :  { %v1048_v25 = vadd.f32 %v1404_v23, %v1047_v24  ;;  %v1488_v26 = vpop.f32.mrb[9].mxu0 }
 0x31a   :  { %v1050_v27 = vpop.f32.mrb[10].mxu0 }
 0x31b   :  { %v1489_v28 = vpop.f32.mrb[11].mxu0  ;;  %1061 = vrot.lane.b32.xlu1 %v1048_v25, %s1747_s14 }
 0x379   :  { %v906_v30 = vpop.permute.xlu0 %905 }
 0x37a   :  { %v910_v31 = vsel %vm907_vm4, %v902_v29, %v906_v30 }
 0x37b   :  { %1479 = vmatmul.mubr.msk.bf16.vlgmr.msra.gmra.mrb[4].mxu1 %vm943_vm5, %v910_v31 }
 0x37c   :  { %1494 = vmatprep.mubr.msk.bf16.mxu1 %vm1750_vm0, %v1749_v0  ;;  %1491 = vmatpush3.bf16.msra.mxu1 %v1547_v46 }
 0x37d   :  { %1492 = vmatprep.subr.bf16.mxu1 %v1749_v0 }
 0x380   :  { %1493 = vmatpush3.bf16.msra.mxu1 %v1548_v48 }
 0x381   :  { %1506 = vmatprep.subr.bf16.mxu1 %v1749_v0 }
 0x38d   :  { %v1062_v12 = vpop.permute.xlu1 %1061 }
 0x44e   :  { %v980_v33 = vpop.f32.mrb[4].mxu1 }
 0x44f   :  { %v981_v34 = vadd.f32 %v1399_v32, %v980_v33  ;;  %v1480_v35 = vpop.f32.mrb[5].mxu1  ;;  %v1549_v32 = vld [vmem:[#allocation8] sm:$0xff]   ;;  %v1550_v33 = vld [vmem:[#allocation8 + $0x8] sm:$0xff]  }
 0x450   :  { %v983_v36 = vpop.f32.mrb[6].mxu1 }
 0x451   :  { %v1053_v37 = vadd.f32 %v1048_v25, %v981_v34  ;;  %v1481_v38 = vpop.f32.mrb[7].mxu1 }
 0x453   :  { %v1408_v40 = vmul.f32 -1.442695, %v1053_v37 }
 0x455   :  { %1585 = vpow2.f32 %v1408_v40 }
 0x45f   :  { %v1586_v41 = vpop.eup %1585 }
 0x460   :  { %v1057_v42 = vadd.f32 1.0, %v1586_v41 }
 0x462   :  { %1587 = vrcp.f32 %v1057_v42  ;;  %v744_v42 = vrot.slane %v2059_v60, %v2018_v39  ;;  %v779_v60 = vrot.slane %v2065_v63, %v2018_v39 }
 0x46c   :  { %v1588_v43 = vpop.eup %1587 }
 0x46d   :  { %v1064_v15 = vmul.f32 %v1588_v43, %v1062_v12  ;;  %v1071_v50 = vsub.f32 1.0, %v1588_v43  ;;  %v751_v12 = vrot.slane %v2063_v62, %v2018_v39  ;;  %v786_v62 = vrot.slane %v2071_v4, %v2018_v39 }
 0x46f   :  { %1066 = vrot.lane.b32.xlu0 %v1064_v15, %s1747_s14  ;;  %v772_v15 = vrot.slane %v2067_v1, %v2018_v39 }
 0x473   :  { %1078 = vrot.lane.b32.xlu0 %v2093_v9, %s1756_s1  ;;  %v1409_v9 = vld [vmem:[%s2265_s0 + $0x2] sm:$0x3]  ;;  %s1759_s0 = smov [#allocation11]  }
 0x474   :  { %v1159_v16 = vpack.c.bf16 %v1409_v9, %v1409_v9  ;;  %s1367_s10 = sshll.u32 %s1759_s0, 4  ;;  %s1368_s10 = int_to_ptr.vmem [resolvable:$true] %s1367_s10 }
 0x476   :  { %1503 = vmatmul.mubr.msk.bf16.vlgmr.msra.gmra.mrb[12].mxu0 %vm142_vm1, %v1159_v16 }
 0x4e1   :  { %v1067_v44 = vpop.permute.xlu0 %1066 }
 0x4e2   :  { %v1069_v45 = vadd.f32 %v1067_v44, %v981_v34 }
 0x4e4   :  { %1589 = vtanh.f32 %v1069_v45 }
 0x4e5   :  { %v1079_v10 = vpop.permute.xlu0 %1078 }
 0x4e6   :  { %v1081_v51 = vmul.f32 %v1588_v43, %v1079_v10  ;;  %v765_v43 = vrot.slane %v2061_v61, %v2018_v39  ;;  %v1419_v61 = vld [vmem:[%s2253_s16] ss:$0 sm:$0xff]  ;;  %s1758_s16 = smov [#allocation10]  }
 0x4ee   :  { %v1590_v49 = vpop.eup %1589 }
 0x4ef   :  { %1073 = vrot.lane.b32.xlu1 %v1590_v49, %s1757_s24  ;;  %v819_v49 = vand.u32 127, %v201_v3 }
 0x549   :  { %v1220_v55 = vpop.f32.mrb[12].mxu0 }
 0x54a   :  { %v1221_v56 = vadd.f32 %v1414_v54, %v1220_v55  ;;  %v1504_v57 = vpop.f32.mrb[13].mxu0 }
 0x54b   :  { %v1223_v58 = vpop.f32.mrb[14].mxu0 }
 0x54c   :  { %v1505_v6 = vpop.f32.mrb[15].mxu0  ;;  %1234 = vrot.lane.b32.xlu0 %v1221_v56, %s1747_s14 }
 0x561   :  { %v1074_v17 = vpop.permute.xlu1 %1073 }
 0x562   :  { %v1076_v52 = vmul.f32 %v1074_v17, %v1071_v50  ;;  %v822_v50 = vsub.s32 %v819_v49, %v1925_v5 }
 0x564   :  { %v2160_v19 = vadd.f32 %v1081_v51, %v1076_v52 }
 0x566   :  { %v1088_v53 = vpack.c.bf16 %v2160_v19, %v2160_v19 }
 0x568   :  { %1102 = vrot.lane.b32.xlu1 %v1088_v53, %s1757_s24 }
 0x5be   :  { %v1235_v26 = vpop.permute.xlu0 %1234 }
 0x5da   :  { %v1103_v7 = vpop.permute.xlu1 %1102 }
 0x5db   :  { %1495 = vmatmul.mubr.msk.bf16.vlgmr.msra.gmra.mrb[8].mxu1 %vm142_vm1, %v1103_v7 }
 0x5dc   :  { %1510 = vmatprep.mubr.msk.bf16.mxu1 %vm1750_vm0, %v1749_v0  ;;  %1507 = vmatpush3.bf16.msra.mxu1 %v1549_v32 }
 0x5dd   :  { %1508 = vmatprep.subr.bf16.mxu1 %v1749_v0  ;;  %v758_v0 = vrot.slane %v2057_v59, %v2018_v39  ;;  %v793_v59 = vrot.slane %v2069_v2, %v2018_v39 }
 0x5e0   :  { %1509 = vmatpush3.bf16.msra.mxu1 %v1550_v33 }
 0x6ae   :  { %v1153_v11 = vpop.f32.mrb[8].mxu1 }
 0x6af   :  { %v1154_v20 = vadd.f32 %v1410_v8, %v1153_v11  ;;  %v1496_v14 = vpop.f32.mrb[9].mxu1 }
 0x6b0   :  { %v1156_v21 = vpop.f32.mrb[10].mxu1 }
 0x6b1   :  { %v1226_v18 = vadd.f32 %v1221_v56, %v1154_v20  ;;  %v1497_v22 = vpop.f32.mrb[11].mxu1 }
 0x6b3   :  { %v1418_v23 = vmul.f32 -1.442695, %v1226_v18 }
 0x6b5   :  { %1591 = vpow2.f32 %v1418_v23 }
 0x6bf   :  { %v1592_v24 = vpop.eup %1591 }
 0x6c0   :  { %v1230_v25 = vadd.f32 1.0, %v1592_v24 }
 0x6c2   :  { %1593 = vrcp.f32 %v1230_v25 }
 0x6cc   :  { %v1594_v27 = vpop.eup %1593 }
 0x6cd   :  { %v1237_v28 = vmul.f32 %v1594_v27, %v1235_v26  ;;  %v1244_v35 = vsub.f32 1.0, %v1594_v27 }
 0x6cf   :  { %1239 = vrot.lane.b32.xlu1 %v1237_v28, %s1747_s14  ;;  %s1354_s14 = sshll.u32 %s1758_s16, 4  ;;  %s1355_s14 = int_to_ptr.vmem [resolvable:$true] %s1354_s14 }
 0x6d0   :  { %s1689_s21 = scalar_lea.vmem %s1355_s14, 64  ;;  %p1694_p5 = scmp.lt.s32.totalorder %s1355_s14, %s1355_s14 }
 0x6d1   :  { %p1690_p4 = scmp.ne.s32.totalorder %s1355_s14, %s1689_s21  ;;  %p1695_p6 = scmp.lt.s32.totalorder %s1689_s21, %s1689_s21 }
 0x6d3   :  { %1251 = vrot.lane.b32.xlu1 %v1409_v9, %s1756_s1  ;;  %p1696_p7 = por %p1695_p6, %p1694_p5 }
 0x6d5   :  { %p1697_p8 = pnand %p1696_p7, %p1690_p4 }
 0x741   :  { %v1240_v29 = vpop.permute.xlu1 %1239 }
 0x742   :  { %v1242_v30 = vadd.f32 %v1240_v29, %v1154_v20 }
 0x744   :  { %1595 = vtanh.f32 %v1242_v30 }
 0x745   :  { %v1252_v34 = vpop.permute.xlu1 %1251 }
 0x746   :  { %v1254_v37 = vmul.f32 %v1594_v27, %v1252_v34 }
 0x74e   :  { %v1596_v31 = vpop.eup %1595 }
 0x74f   :  { %1246 = vrot.lane.b32.xlu0 %v1596_v31, %s1757_s24 }
 0x7c1   :  { %v1247_v36 = vpop.permute.xlu0 %1246 }
 0x7c2   :  { %v1249_v38 = vmul.f32 %v1247_v36, %v1244_v35 }
 0x7c4   :  { %v1255_v40 = vadd.f32 %v1254_v37, %v1249_v38 }
 0x7c6   :  { %v1262_v41 = vpack.c.bf16 %v1255_v40, %v1255_v40 }
 0x7c8   :  { %1275 = vrot.lane.b32.xlu0 %v1262_v41, %s1757_s24 }
 0x7cc   :  { %795 = vperm.xlu0 %1532, %v744_v42  }
 0x7d0   :  { %798 = vperm.xlu0 %1532, %v751_v12  }
 0x7d4   :  { %801 = vperm.xlu0 %1532, %v758_v0  }
 0x7d8   :  { %804 = vperm.xlu0 %1532, %v765_v43  }
 0x7dc   :  { %807 = vperm.xlu0 %1532, %v772_v15  }
 0x7e0   :  { %810 = vperm.xlu0 %1532, %v779_v60  }
 0x7e4   :  { %813 = vperm.xlu0 %1532, %v786_v62  }
 0x7e8   :  { %816 = vperm.xlu0 %1532, %v793_v59  }
 0x83a   :  { %v1276_v44 = vpop.permute.xlu0 %1275 }
 0x83b   :  { %1511 = vmatmul.mubr.msk.bf16.vlgmr.msra.gmra.mrb[12].mxu1 %vm142_vm1, %v1276_v44 }
 0x84b   :  { %v796_v39 = vpop.permute.xlu0 %795 }
 0x84c   :  { %v823_v52 = vrot.slane %v796_v39, %v822_v50 }
 0x84f   :  { %v799_v2 = vpop.permute.xlu0 %798 }
 0x850   :  { %v827_v17 = vrot.slane %v799_v2, %v822_v50 }
 0x852   :  { %v853_v55 = vsel %vm852_vm7, %v827_v17, %v823_v52 }
 0x853   :  { %v802_v47 = vpop.permute.xlu0 %801 }
 0x854   :  { %v831_v51 = vrot.slane %v802_v47, %v822_v50 }
 0x856   :  { %v855_v57 = vsel %vm854_vm8, %v831_v51, %v853_v55 }
 0x857   :  { %v805_v9 = vpop.permute.xlu0 %804 }
 0x858   :  { %v835_v53 = vrot.slane %v805_v9, %v822_v50 }
 0x85a   :  { %v857_v6 = vsel %vm856_vm9, %v835_v53, %v855_v57 }
 0x85b   :  { %v808_v48 = vpop.permute.xlu0 %807 }
 0x85f   :  { %v811_v16 = vpop.permute.xlu0 %810 }
 0x860   :  { %v843_v56 = vrot.slane %v811_v16, %v822_v50 }
 0x863   :  { %v814_v10 = vpop.permute.xlu0 %813 }
 0x864   :  { %v847_v58 = vrot.slane %v814_v10, %v822_v50 }
 0x867   :  { %v817_v54 = vpop.permute.xlu0 %816 }
 0x868   :  { %v851_v3 = vrot.slane %v817_v54, %v822_v50 }
 0x90e   :  { %v1326_v1 = vpop.f32.mrb[12].mxu1 }
 0x90f   :  { %v2194_v45 = vadd.f32 %v1419_v61, %v1326_v1  ;;  %v1512_v63 = vpop.f32.mrb[13].mxu1 }
 0x910   :  { %v1329_v13 = vpop.f32.mrb[14].mxu1 }
 0x911   :  { %v1513_v46 = vpop.f32.mrb[15].mxu1  ;;  %v1333_v4 = vsel %vm1332_vm6, %v2194_v45, -inf }
 0x912   :  { %1334 = vmax.xlane.f32.xlu1 %v1333_v4 }
 0x923   :  { %1084 = vrot.lane.b32.xlu1 %v2160_v19, %s1757_s24  ;;  %v839_v19 = vrot.slane %v808_v48, %v822_v50 }
 0x925   :  { %v859_v7 = vsel %vm858_vm10, %v839_v19, %v857_v6 }
 0x926   :  { %v861_v5 = vsel %vm860_vm11, %v843_v56, %v859_v7 }
 0x927   :  { %1257 = vrot.lane.b32.xlu1 %v1255_v40, %s1757_s24  ;;  %v863_v8 = vsel %vm862_vm12, %v847_v58, %v861_v5 }
 0x928   :  { %v865_v11 = vsel %vm864_vm13, %v851_v3, %v863_v8 }
 0x950   :  { %867 = vxpose.xlu1.b32.start.end [1/1] (short) (narrow) %v865_v11, 8 }
 0x99f   :  { %v1335_v20 = vpop.xlane.xlu1 %1334 }
 0x9a0   :  { %v1336_v14 = vsub.f32 %v2194_v45, %v1335_v20 }
 0x9a2   :  { %v1337_v21 = vmul.f32 1.442695, %v1336_v14 }
 0x9a3   :  { %v1085_v18 = vpop.permute.xlu1 %1084 }
 0x9a4   :  { %1597 = vpow2.f32 %v1337_v21  ;;  %1087 = vst.msk [vmem:[#allocation10] sm:$0x3] %vm722_vm3, %v1085_v18 }
 0x9a7   :  { %v1258_v22 = vpop.permute.xlu1 %1257 }
 0x9a8   :  { %1261 = vst.msk [vmem:[#allocation10 + $0x2] sm:$0x3] %vm722_vm3, %v1258_v22 }
 0x9ae   :  { %v1598_v23 = vpop.eup %1597 }
 0x9af   :  { %v1339_v24 = vsel %vm1332_vm6, %v1598_v23, 0.0 }
 0x9b0   :  { %1340 = vadd.xlane.f32.xlu0 %v1339_v24 }
 0x9d0   :  { %v883_v25 = vpop.trf.xlu1 }
 0x9d1   :  { %v900_v26 = vsel %vm899_vm14, %v883_v25, 0.0 }
 0x9d2   :  { %1700 = shalt.err (!%p1697_p8)
}
 0x9d3   :  { %s1701_s3 = scalar_lea.hbm %s2255_s18, 64 }
 0x9d4   :  { %p1702_p9 = scmp.ne.s32.totalorder %s2255_s18, %s1701_s3  ;;  %p1705_p10 = scmp.lt.u32.totalorder %s1701_s3, %s2255_s18 }
 0x9d6   :  { %p1707_p11 = pnand %p1705_p10, %p1702_p9 }
 0x9d8   :  { %1710 = shalt.err (!%p1707_p11)
}
 0x9d9   :  { %s1760_s28 = smov 2   ;;  %901 = vst [vmem:[#allocation11] sm:$0x3] %v900_v26  ;;  %s1711_s4 = scalar_lea.vmem %s1368_s10, 32 }
 0x9da   :  { %1360 = dma.vmem_to_hbm [thread:$0]  %s1355_s14, 64, %s2255_s18, [#allocation4], %s1756_s1, %s1756_s1, %s1760_s28  }
 0x9db   :  { %p1712_p12 = scmp.ne.s32.totalorder %s1368_s10, %s1711_s4  ;;  %p1716_p13 = scmp.lt.s32.totalorder %s1368_s10, %s1368_s10 }
 0x9dc   :  { %p1717_p0 = scmp.lt.s32.totalorder %s1711_s4, %s1711_s4 }
 0x9de   :  { %p1718_p1 = por %p1717_p0, %p1716_p13 }
 0x9e0   :  { %p1719_p2 = pnand %p1718_p1, %p1712_p12 }
 0x9e2   :  { %1722 = shalt.err (!%p1719_p2)
}
 0x9e3   :  { %s1723_s5 = scalar_lea.hbm %s2256_s19, 32 }
 0x9e4   :  { %p1724_p3 = scmp.ne.s32.totalorder %s2256_s19, %s1723_s5  ;;  %p1727_p4 = scmp.lt.u32.totalorder %s1723_s5, %s2256_s19 }
 0x9e6   :  { %p1729_p5 = pnand %p1727_p4, %p1724_p3 }
 0x9e8   :  { %1732 = shalt.err (!%p1729_p5)
}
 0x9e9   :  { %1370 = dma.vmem_to_hbm [thread:$0]  %s1368_s10, 32, %s2256_s19, [#allocation12]  }
 0xa3d   :  { %v1341_v27 = vpop.xlane.xlu0 %1340 }
 0xa3e   :  { %1599 = vlog2.f32 %v1341_v27 }
 0xa48   :  { %v1600_v28 = vpop.eup %1599 }
 0xa49   :  { %v1343_v29 = vmul.f32 0.6931472, %v1600_v28 }
 0xa4b   :  { %v1344_v30 = vadd.f32 %v1343_v29, %v1335_v20 }
 0xa4d   :  { %v1345_v31 = vsub.f32 %v2194_v45, %v1344_v30 }
 0xa4f   :  { %1346 = vst [vmem:[%s2254_s17] sm:$0x3] %v1345_v31 }
 0xa50   :  { %1739 = dma.done.wait [#allocation4], 64  }
 0xa51   :  { %1740 = vsyncadd [#allocation4], 4294967232 }
 0xa52   :  { %1741 = dma.done.wait [#allocation12], 32  }
 0xa53   :  { %1742 = vsyncadd [#allocation12], 4294967264 }
 0xa54   :  { %1379 = vsyncpa [#allocation3], 1 }
 0xa55   :  { %1380 = vsyncpa [#allocation6], 1 }
 0xa56   :  { %1381 = vsyncpa [#allocation9], 1 }
 0xa57   :  { %1382 = vsyncpa [#allocation4], 1 }
 0xa58   :  { %1383 = vsyncpa [#allocation12], 1 }

</bundles_post_ra>
